<compile_context>
chip_gen: v7x
topology: tpu7x:2x2x1
jax: 0.10.0
libtpu: 0.0.40
codegen_flags: <defaults>
</compile_context>

<pallas_src>
import jax
import jax.numpy as jnp
from jax import lax
from jax.experimental import pallas as pl
from jax.experimental.pallas import tpu as pltpu

# --- model hyperparameters (RankingLossSurrogate defaults) ---
INPUT_DIM = 4    # input_dim
OUT_DS = 2       # out_ds     (DeepSet output dim)
H_SC = 16        # hidden_dim_scorer
H_DS = 16        # hidden_dim_ds
LATENT = 8       # DeepSet latent_dim
M = 10           # ensemble size
MH = M * H_SC    # fused scorer hidden width (160)

# --- packed DeepSet weight slab (rows, 8-aligned block offsets) ---
_R_PW1A, _R_PW1B, _R_PW2, _R_PW3, _R_RW1, _R_RW2, _R_RW3 = 0, 8, 16, 32, 48, 64, 80
_DSW_ROWS = 96
# --- packed fused-scorer layer-1 slab ---
_R_SW1A, _R_SW1B = 0, 16
_SCW1_ROWS = 24


def _relu(x):
    return jnp.maximum(x, 0.0)


def ranking_surrogate_kernel(sX_ref, sy_ref, qX_ref,
                             dsw_ref, dsb_ref, scw1_ref, scw2_ref, scb_ref,
                             out_ref):
    tb, ns, d = sX_ref.shape
    nq = qX_ref.shape[1]

    # Collapse the batch tile into the row (sublane) axis.
    sx = sX_ref[...].reshape(tb * ns, d)        # (TB*Ns, D)
    sy = sy_ref[...].reshape(tb * ns, 1)        # (TB*Ns, 1)
    qx = qX_ref[...].reshape(tb * nq, d)        # (TB*Nq, D)

    # --- packed DeepSet parameters (see pack_params for slab layout) ---
    pW1a = dsw_ref[_R_PW1A:_R_PW1A + INPUT_DIM, :]   # (D, H_DS)
    pW1b = dsw_ref[_R_PW1B:_R_PW1B + 1, :]           # (1, H_DS)
    pW2 = dsw_ref[_R_PW2:_R_PW2 + H_DS, :]
    pW3p = dsw_ref[_R_PW3:_R_PW3 + H_DS, :]          # cols >= LATENT are zero
    rW1p = dsw_ref[_R_RW1:_R_RW1 + H_DS, :]          # rows >= LATENT are zero
    rW2 = dsw_ref[_R_RW2:_R_RW2 + H_DS, :]
    rW3p = dsw_ref[_R_RW3:_R_RW3 + H_DS, :]          # cols >= OUT_DS are zero
    pb1, pb2, pb3p = dsb_ref[0:1, :], dsb_ref[1:2, :], dsb_ref[2:3, :]
    rb1, rb2, rb3p = dsb_ref[3:4, :], dsb_ref[4:5, :], dsb_ref[5:6, :]

    # --- DeepSet phi (cat(s_X, s_y) @ W1 folded into two terms) ---
    h = jnp.dot(sx, pW1a, preferred_element_type=jnp.float32) + sy * pW1b + pb1
    h = _relu(h)
    h = _relu(jnp.dot(h, pW2, preferred_element_type=jnp.float32) + pb2)    # (TB*Ns, H_DS)

    # --- per-batch set mean (segment mean as a masked matmul), commuted through
    #     the linear third phi layer ---
    rs = lax.broadcasted_iota(jnp.int32, (tb, tb * ns), 1)
    bs = lax.broadcasted_iota(jnp.int32, (tb, tb * ns), 0) * ns
    avg = jnp.where((rs >= bs) & (rs < bs + ns), 1.0 / ns, 0.0)             # (TB, TB*Ns)
    hm = jnp.dot(avg, h, preferred_element_type=jnp.float32)                # (TB, H_DS)
    zm = jnp.dot(hm, pW3p, preferred_element_type=jnp.float32) + pb3p       # (TB, 16), padded cols 0

    # --- DeepSet rho ---
    r = _relu(jnp.dot(zm, rW1p, preferred_element_type=jnp.float32) + rb1)
    r = _relu(jnp.dot(r, rW2, preferred_element_type=jnp.float32) + rb2)
    e = jnp.dot(r, rW3p, preferred_element_type=jnp.float32) + rb3p         # (TB, 16), cols >= OUT_DS zero

    # --- fused scorer ensemble: two wide matmuls + one lane reduction ---
    sW1a_p = scw1_ref[_R_SW1A:_R_SW1A + H_DS, :]        # (16, M*H) rows >= OUT_DS zero
    sW1b_c = scw1_ref[_R_SW1B:_R_SW1B + INPUT_DIM, :]   # (D, M*H)
    sb1_c = scb_ref[0:1, :]                             # (1, M*H)
    b2_c = scb_ref[1:2, :]                              # (1, M*H)
    w3_v = scb_ref[2:3, :]                              # (1, M*H)  (concat W3_m / M)
    b3m = scb_ref[3:4, 0:1]                             # (1, 1)    (mean of b3_m)

    # Per-batch effective layer-1 bias (embedding contribution hoisted out of the
    # wide matmul), broadcast to all queries of its batch via a 0/1 selection matmul.
    bias_eff = jnp.dot(e, sW1a_p, preferred_element_type=jnp.float32) + sb1_c   # (TB, M*H)
    rq = lax.broadcasted_iota(jnp.int32, (tb * nq, tb), 0)
    bq = lax.broadcasted_iota(jnp.int32, (tb * nq, tb), 1) * nq
    sel = jnp.where((rq >= bq) & (rq < bq + nq), 1.0, 0.0)                      # (TB*Nq, TB)
    bias_full = jnp.dot(sel, bias_eff, preferred_element_type=jnp.float32)      # (TB*Nq, M*H)

    a1 = _relu(jnp.dot(qx, sW1b_c, preferred_element_type=jnp.float32) + bias_full)
    a2 = _relu(jnp.dot(a1, scw2_ref[...], preferred_element_type=jnp.float32) + b2_c)

    # Last layer + 1/M head average folded into a lane reduction; lane-dense store.
    p = a2 * w3_v                                         # (TB*Nq, M*H)
    out = jnp.sum(p.reshape(tb, nq, MH), axis=-1) + b3m   # (TB, Nq)
    out_ref[...] = out.astype(out_ref.dtype)


def _pick_tb(B):
    # Batch tile: amortize the ~0.35 us per-grid-step overhead, keep >= 2 grid steps
    # when possible (v7x shards the 'parallel' grid across 2 TensorCores), and keep
    # the 2-D output block's sublane dim either 8-aligned or equal to B.
    # TODO(synk): for large Ns/Nq re-derive TB against the VMEM budget (v7x: 64 MiB
    # physical / 32 MiB scoped) — the fused (TB*Nq, 160) f32 intermediate dominates.
    if B <= 8:
        return B
    for tb in (64, 32, 16, 8):
        if tb < B and B % tb == 0:
            return tb
    return B


def ranking_loss_surrogate_forward(s_X, s_y, q_X, packed, *, tb=None):
    B, Ns, D = s_X.shape
    _, Nq, _ = q_X.shape
    if tb is None:
        tb = _pick_tb(B)
    assert B % tb == 0
    assert tb == B or tb % 8 == 0, "output block sublane dim must be 8-aligned"
    grid = (B // tb,)

    data_specs = [
        pl.BlockSpec((tb, Ns, D), lambda b: (b, 0, 0)),
        pl.BlockSpec((tb, Ns, 1), lambda b: (b, 0, 0)),
        pl.BlockSpec((tb, Nq, D), lambda b: (b, 0, 0)),
    ]
    # Packed parameter slabs: whole array resident for every grid step.
    param_specs = [pl.BlockSpec(p.shape, lambda b: (0, 0)) for p in packed]
    out_spec = pl.BlockSpec((tb, Nq), lambda b: (b, 0))

    out2d = pl.pallas_call(
        ranking_surrogate_kernel,
        out_shape=jax.ShapeDtypeStruct((B, Nq), jnp.float32),
        grid=grid,
        in_specs=data_specs + param_specs,
        out_specs=out_spec,
        compiler_params=pltpu.CompilerParams(dimension_semantics=("parallel",)),
    )(s_X, s_y, q_X, *packed)
    return out2d[..., None]          # match the module's (B, Nq, 1) output


# --- deterministic parameter initialization (PyTorch-Linear-style uniform) ---
def _linear(key, fan_in, fan_out):
    bound = 1.0 / float(fan_in) ** 0.5
    kw, kb = jax.random.split(key)
    W = jax.random.uniform(kw, (fan_in, fan_out), jnp.float32, -bound, bound)
    b = jax.random.uniform(kb, (fan_out,), jnp.float32, -bound, bound)
    return W, b


def init_params(key):
    keys = jax.random.split(key, 6 + 3 * M)
    ki = iter(keys)
    # DeepSet phi: (D+1) -> H_DS -> H_DS -> LATENT
    phi = [_linear(next(ki), INPUT_DIM + 1, H_DS),
           _linear(next(ki), H_DS, H_DS),
           _linear(next(ki), H_DS, LATENT)]
    # DeepSet rho: LATENT -> H_DS -> H_DS -> OUT_DS
    rho = [_linear(next(ki), LATENT, H_DS),
           _linear(next(ki), H_DS, H_DS),
           _linear(next(ki), H_DS, OUT_DS)]
    # M scorers: (OUT_DS + D) -> H_SC -> H_SC -> 1
    scorers = []
    for _ in range(M):
        scorers.append((_linear(next(ki), OUT_DS + INPUT_DIM, H_SC),
                        _linear(next(ki), H_SC, H_SC),
                        _linear(next(ki), H_SC, 1)))
    return phi, rho, scorers


# --- host-side packing of the 20 raw tensors into 5 padded VMEM slabs ---
def pack_params(raw):
    phi, rho, scorers = raw
    (pW1, pb1), (pW2, pb2), (pW3, pb3) = phi
    (rW1, rb1), (rW2, rb2), (rW3, rb3) = rho

    ds_w = jnp.zeros((_DSW_ROWS, H_DS), jnp.float32)
    ds_w = ds_w.at[_R_PW1A:_R_PW1A + INPUT_DIM, :].set(pW1[:INPUT_DIM])   # s_X part of W1
    ds_w = ds_w.at[_R_PW1B:_R_PW1B + 1, :].set(pW1[INPUT_DIM:])           # s_y part of W1
    ds_w = ds_w.at[_R_PW2:_R_PW2 + H_DS, :].set(pW2)
    ds_w = ds_w.at[_R_PW3:_R_PW3 + H_DS, :LATENT].set(pW3)                # pad cols -> 16
    ds_w = ds_w.at[_R_RW1:_R_RW1 + LATENT, :].set(rW1)                    # pad rows -> 16
    ds_w = ds_w.at[_R_RW2:_R_RW2 + H_DS, :].set(rW2)
    ds_w = ds_w.at[_R_RW3:_R_RW3 + H_DS, :OUT_DS].set(rW3)                # pad cols -> 16

    ds_b = jnp.zeros((8, H_DS), jnp.float32)
    ds_b = ds_b.at[0, :].set(pb1)
    ds_b = ds_b.at[1, :].set(pb2)
    ds_b = ds_b.at[2, :LATENT].set(pb3)
    ds_b = ds_b.at[3, :].set(rb1)
    ds_b = ds_b.at[4, :].set(rb2)
    ds_b = ds_b.at[5, :OUT_DS].set(rb3)

    sW1a = jnp.concatenate([s[0][0][:OUT_DS] for s in scorers], axis=1)   # (OUT_DS, M*H)
    sW1b = jnp.concatenate([s[0][0][OUT_DS:] for s in scorers], axis=1)   # (D, M*H)
    sb1c = jnp.concatenate([s[0][1] for s in scorers], axis=0)            # (M*H,)
    b2c = jnp.concatenate([s[1][1] for s in scorers], axis=0)             # (M*H,)
    w3v = jnp.concatenate([s[2][0][:, 0] for s in scorers], axis=0) / M   # (M*H,), 1/M folded
    b3m = jnp.mean(jnp.stack([s[2][1][0] for s in scorers]))              # mean(b3)

    sc_w1 = jnp.zeros((_SCW1_ROWS, MH), jnp.float32)
    sc_w1 = sc_w1.at[_R_SW1A:_R_SW1A + OUT_DS, :].set(sW1a)               # pad rows -> 16
    sc_w1 = sc_w1.at[_R_SW1B:_R_SW1B + INPUT_DIM, :].set(sW1b)

    sc_w2 = jnp.zeros((MH, MH), jnp.float32)                              # block-diagonal W2
    for m, s in enumerate(scorers):
        sc_w2 = sc_w2.at[m * H_SC:(m + 1) * H_SC, m * H_SC:(m + 1) * H_SC].set(s[1][0])

    sc_b = jnp.zeros((8, MH), jnp.float32)
    sc_b = sc_b.at[0, :].set(sb1c)
    sc_b = sc_b.at[1, :].set(b2c)
    sc_b = sc_b.at[2, :].set(w3v)
    sc_b = sc_b.at[3, 0].set(b3m)

    return ds_w, ds_b, sc_w1, sc_w2, sc_b


# --- pure-JAX reference mirroring the PyTorch forward (uses the RAW, unfused params) ---
def reference_forward(s_X, s_y, q_X, raw):
    phi, rho, scorers = raw
    x = jnp.concatenate([s_X, s_y], axis=-1)
    for i, (W, b) in enumerate(phi):
        x = x @ W + b
        if i < 2:
            x = jax.nn.relu(x)
    x = jnp.mean(x, axis=-2)
    for i, (W, b) in enumerate(rho):
        x = x @ W + b
        if i < 2:
            x = jax.nn.relu(x)
    e = x                                                               # (B, OUT_DS)
    e_rep = jnp.broadcast_to(e[:, None, :], (q_X.shape[0], q_X.shape[1], OUT_DS))
    qc = jnp.concatenate([e_rep, q_X], axis=-1)
    preds = []
    for (W1, b1), (W2, b2), (W3, b3) in scorers:
        a = jax.nn.relu(qc @ W1 + b1)
        a = jax.nn.relu(a @ W2 + b2)
        preds.append(a @ W3 + b3)
    return jnp.mean(jnp.stack(preds), axis=0)                           # (B, Nq, 1)


if __name__ == "__main__":
    key = jax.random.PRNGKey(0)
    B, Ns, Nq = 16, 8, 8
    k1, k2, k3, kp = jax.random.split(key, 4)
    s_X = jax.random.normal(k1, (B, Ns, INPUT_DIM), jnp.float32)
    s_y = jax.random.normal(k2, (B, Ns, 1), jnp.float32)
    q_X = jax.random.normal(k3, (B, Nq, INPUT_DIM), jnp.float32)

    raw = init_params(kp)
    packed = pack_params(raw)

    out = ranking_loss_surrogate_forward(s_X, s_y, q_X, packed)
    out = jax.block_until_ready(out)

    ref = reference_forward(s_X, s_y, q_X, raw)
    assert out.shape == (B, Nq, 1), out.shape
    max_err = float(jnp.max(jnp.abs(out - ref)))
    assert jnp.allclose(out, ref, atol=1e-4, rtol=1e-4), max_err
    print("KERNEL_OK")
</pallas_src>

<mosaic_0001>
module attributes {stable_mosaic.version = 11 : i64} {
  func.func @ranking_surrogate_kernel(%arg0: i32, %arg1: memref<8x8x4xf32, #tpu.memory_space<vmem>>, %arg2: memref<8x8x1xf32, #tpu.memory_space<vmem>>, %arg3: memref<8x8x4xf32, #tpu.memory_space<vmem>>, %arg4: memref<96x16xf32, #tpu.memory_space<vmem>>, %arg5: memref<8x16xf32, #tpu.memory_space<vmem>>, %arg6: memref<24x160xf32, #tpu.memory_space<vmem>>, %arg7: memref<160x160xf32, #tpu.memory_space<vmem>>, %arg8: memref<8x160xf32, #tpu.memory_space<vmem>>, %arg9: memref<8x8xf32, #tpu.memory_space<vmem>>) attributes {dimension_semantics = [#tpu.dimension_semantics<parallel>], iteration_bounds = array<i64: 2>, scalar_prefetch = 0 : i64, scratch_operands = 0 : i64, tpu.core_type = #tpu.core_type<tc>, window_params = [{transform_indices = @transform_0, window_bounds = array<i64: 8, 8, 4>}, {transform_indices = @transform_1, window_bounds = array<i64: 8, 8, 1>}, {transform_indices = @transform_2, window_bounds = array<i64: 8, 8, 4>}, {pipeline_mode = #tpu.pipeline_mode<synchronous>, transform_indices = @transform_3, window_bounds = array<i64: 96, 16>}, {pipeline_mode = #tpu.pipeline_mode<synchronous>, transform_indices = @transform_4, window_bounds = array<i64: 8, 16>}, {pipeline_mode = #tpu.pipeline_mode<synchronous>, transform_indices = @transform_5, window_bounds = array<i64: 24, 160>}, {pipeline_mode = #tpu.pipeline_mode<synchronous>, transform_indices = @transform_6, window_bounds = array<i64: 160, 160>}, {pipeline_mode = #tpu.pipeline_mode<synchronous>, transform_indices = @transform_7, window_bounds = array<i64: 8, 160>}, {transform_indices = @transform_8, window_bounds = array<i64: 8, 8>}]} {
    %c0 = arith.constant 0 : index
    %c0_0 = arith.constant 0 : index
    %c0_1 = arith.constant 0 : index
    %0 = vector.load %arg1[%c0, %c0_0, %c0_1] : memref<8x8x4xf32, #tpu.memory_space<vmem>>, vector<8x8x4xf32>
    %1 = vector.shape_cast %0 : vector<8x8x4xf32> to vector<64x4xf32>
    %c0_2 = arith.constant 0 : index
    %c0_3 = arith.constant 0 : index
    %c0_4 = arith.constant 0 : index
    %2 = vector.load %arg2[%c0_2, %c0_3, %c0_4] : memref<8x8x1xf32, #tpu.memory_space<vmem>>, vector<8x8x1xf32>
    %3 = vector.shape_cast %2 : vector<8x8x1xf32> to vector<64x1xf32>
    %c0_5 = arith.constant 0 : index
    %c0_6 = arith.constant 0 : index
    %c0_7 = arith.constant 0 : index
    %4 = vector.load %arg3[%c0_5, %c0_6, %c0_7] : memref<8x8x4xf32, #tpu.memory_space<vmem>>, vector<8x8x4xf32>
    %5 = vector.shape_cast %4 : vector<8x8x4xf32> to vector<64x4xf32>
    %c0_8 = arith.constant 0 : index
    %c0_9 = arith.constant 0 : index
    %6 = vector.load %arg4[%c0_8, %c0_9] : memref<96x16xf32, #tpu.memory_space<vmem>>, vector<4x16xf32>
    %c8 = arith.constant 8 : index
    %c0_10 = arith.constant 0 : index
    %7 = vector.load %arg4[%c8, %c0_10] : memref<96x16xf32, #tpu.memory_space<vmem>>, vector<1x16xf32>
    %c16 = arith.constant 16 : index
    %c0_11 = arith.constant 0 : index
    %8 = vector.load %arg4[%c16, %c0_11] : memref<96x16xf32, #tpu.memory_space<vmem>>, vector<16x16xf32>
    %c32 = arith.constant 32 : index
    %c0_12 = arith.constant 0 : index
    %9 = vector.load %arg4[%c32, %c0_12] : memref<96x16xf32, #tpu.memory_space<vmem>>, vector<16x16xf32>
    %c48 = arith.constant 48 : index
    %c0_13 = arith.constant 0 : index
    %10 = vector.load %arg4[%c48, %c0_13] : memref<96x16xf32, #tpu.memory_space<vmem>>, vector<16x16xf32>
    %c64 = arith.constant 64 : index
    %c0_14 = arith.constant 0 : index
    %11 = vector.load %arg4[%c64, %c0_14] : memref<96x16xf32, #tpu.memory_space<vmem>>, vector<16x16xf32>
    %c80 = arith.constant 80 : index
    %c0_15 = arith.constant 0 : index
    %12 = vector.load %arg4[%c80, %c0_15] : memref<96x16xf32, #tpu.memory_space<vmem>>, vector<16x16xf32>
    %c0_16 = arith.constant 0 : index
    %c0_17 = arith.constant 0 : index
    %13 = vector.load %arg5[%c0_16, %c0_17] : memref<8x16xf32, #tpu.memory_space<vmem>>, vector<1x16xf32>
    %c1 = arith.constant 1 : index
    %c0_18 = arith.constant 0 : index
    %14 = vector.load %arg5[%c1, %c0_18] : memref<8x16xf32, #tpu.memory_space<vmem>>, vector<1x16xf32>
    %c2 = arith.constant 2 : index
    %c0_19 = arith.constant 0 : index
    %15 = vector.load %arg5[%c2, %c0_19] : memref<8x16xf32, #tpu.memory_space<vmem>>, vector<1x16xf32>
    %c3 = arith.constant 3 : index
    %c0_20 = arith.constant 0 : index
    %16 = vector.load %arg5[%c3, %c0_20] : memref<8x16xf32, #tpu.memory_space<vmem>>, vector<1x16xf32>
    %c4 = arith.constant 4 : index
    %c0_21 = arith.constant 0 : index
    %17 = vector.load %arg5[%c4, %c0_21] : memref<8x16xf32, #tpu.memory_space<vmem>>, vector<1x16xf32>
    %c5 = arith.constant 5 : index
    %c0_22 = arith.constant 0 : index
    %18 = vector.load %arg5[%c5, %c0_22] : memref<8x16xf32, #tpu.memory_space<vmem>>, vector<1x16xf32>
    %cst = arith.constant dense<0.000000e+00> : vector<64x16xf32>
    %19 = tpu.matmul %1, %6, %cst {dimension_numbers = #tpu.dot_dimension_numbers<[1], [0], [0], [1], [0, 0, 1, 1], [], []>} : vector<64x4xf32>, vector<4x16xf32>, vector<64x16xf32> -> vector<64x16xf32>
    %20 = vector.broadcast %3 : vector<64x1xf32> to vector<64x16xf32>
    %21 = vector.broadcast %7 : vector<1x16xf32> to vector<64x16xf32>
    %22 = arith.mulf %20, %21 : vector<64x16xf32>
    %23 = arith.addf %19, %22 : vector<64x16xf32>
    %24 = vector.broadcast %13 : vector<1x16xf32> to vector<64x16xf32>
    %25 = arith.addf %23, %24 : vector<64x16xf32>
    %cst_23 = arith.constant 0.000000e+00 : f32
    %26 = vector.broadcast %cst_23 : f32 to vector<64x16xf32>
    %27 = arith.maximumf %25, %26 : vector<64x16xf32>
    %cst_24 = arith.constant dense<0.000000e+00> : vector<64x16xf32>
    %28 = tpu.matmul %27, %8, %cst_24 {dimension_numbers = #tpu.dot_dimension_numbers<[1], [0], [0], [1], [0, 0, 1, 1], [], []>} : vector<64x16xf32>, vector<16x16xf32>, vector<64x16xf32> -> vector<64x16xf32>
    %29 = vector.broadcast %14 : vector<1x16xf32> to vector<64x16xf32>
    %30 = arith.addf %28, %29 : vector<64x16xf32>
    %cst_25 = arith.constant 0.000000e+00 : f32
    %31 = vector.broadcast %cst_25 : f32 to vector<64x16xf32>
    %32 = arith.maximumf %30, %31 : vector<64x16xf32>
    %33 = tpu.iota {dimensions = array<i32: 1>} : vector<8x64xi32>
    %34 = tpu.iota {dimensions = array<i32: 0>} : vector<8x64xi32>
    %c8_i32 = arith.constant 8 : i32
    %35 = vector.broadcast %c8_i32 : i32 to vector<8x64xi32>
    %36 = arith.muli %34, %35 : vector<8x64xi32>
    %37 = arith.cmpi sge, %33, %36 : vector<8x64xi32>
    %c8_i32_26 = arith.constant 8 : i32
    %38 = vector.broadcast %c8_i32_26 : i32 to vector<8x64xi32>
    %39 = arith.addi %36, %38 : vector<8x64xi32>
    %40 = arith.cmpi slt, %33, %39 : vector<8x64xi32>
    %41 = arith.andi %37, %40 : vector<8x64xi1>
    %cst_27 = arith.constant 1.250000e-01 : f32
    %cst_28 = arith.constant 0.000000e+00 : f32
    %42 = vector.broadcast %cst_27 : f32 to vector<8x64xf32>
    %43 = vector.broadcast %cst_28 : f32 to vector<8x64xf32>
    %44 = arith.select %41, %42, %43 : vector<8x64xi1>, vector<8x64xf32>
    %cst_29 = arith.constant dense<0.000000e+00> : vector<8x16xf32>
    %45 = tpu.matmul %44, %32, %cst_29 {dimension_numbers = #tpu.dot_dimension_numbers<[1], [0], [0], [1], [0, 0, 1, 1], [], []>} : vector<8x64xf32>, vector<64x16xf32>, vector<8x16xf32> -> vector<8x16xf32>
    %cst_30 = arith.constant dense<0.000000e+00> : vector<8x16xf32>
    %46 = tpu.matmul %45, %9, %cst_30 {dimension_numbers = #tpu.dot_dimension_numbers<[1], [0], [0], [1], [0, 0, 1, 1], [], []>} : vector<8x16xf32>, vector<16x16xf32>, vector<8x16xf32> -> vector<8x16xf32>
    %47 = vector.broadcast %15 : vector<1x16xf32> to vector<8x16xf32>
    %48 = arith.addf %46, %47 : vector<8x16xf32>
    %cst_31 = arith.constant dense<0.000000e+00> : vector<8x16xf32>
    %49 = tpu.matmul %48, %10, %cst_31 {dimension_numbers = #tpu.dot_dimension_numbers<[1], [0], [0], [1], [0, 0, 1, 1], [], []>} : vector<8x16xf32>, vector<16x16xf32>, vector<8x16xf32> -> vector<8x16xf32>
    %50 = vector.broadcast %16 : vector<1x16xf32> to vector<8x16xf32>
    %51 = arith.addf %49, %50 : vector<8x16xf32>
    %cst_32 = arith.constant 0.000000e+00 : f32
    %52 = vector.broadcast %cst_32 : f32 to vector<8x16xf32>
    %53 = arith.maximumf %51, %52 : vector<8x16xf32>
    %cst_33 = arith.constant dense<0.000000e+00> : vector<8x16xf32>
    %54 = tpu.matmul %53, %11, %cst_33 {dimension_numbers = #tpu.dot_dimension_numbers<[1], [0], [0], [1], [0, 0, 1, 1], [], []>} : vector<8x16xf32>, vector<16x16xf32>, vector<8x16xf32> -> vector<8x16xf32>
    %55 = vector.broadcast %17 : vector<1x16xf32> to vector<8x16xf32>
    %56 = arith.addf %54, %55 : vector<8x16xf32>
    %cst_34 = arith.constant 0.000000e+00 : f32
    %57 = vector.broadcast %cst_34 : f32 to vector<8x16xf32>
    %58 = arith.maximumf %56, %57 : vector<8x16xf32>
    %cst_35 = arith.constant dense<0.000000e+00> : vector<8x16xf32>
    %59 = tpu.matmul %58, %12, %cst_35 {dimension_numbers = #tpu.dot_dimension_numbers<[1], [0], [0], [1], [0, 0, 1, 1], [], []>} : vector<8x16xf32>, vector<16x16xf32>, vector<8x16xf32> -> vector<8x16xf32>
    %60 = vector.broadcast %18 : vector<1x16xf32> to vector<8x16xf32>
    %61 = arith.addf %59, %60 : vector<8x16xf32>
    %c0_36 = arith.constant 0 : index
    %c0_37 = arith.constant 0 : index
    %62 = vector.load %arg6[%c0_36, %c0_37] : memref<24x160xf32, #tpu.memory_space<vmem>>, vector<16x160xf32>
    %c16_38 = arith.constant 16 : index
    %c0_39 = arith.constant 0 : index
    %63 = vector.load %arg6[%c16_38, %c0_39] : memref<24x160xf32, #tpu.memory_space<vmem>>, vector<4x160xf32>
    %c0_40 = arith.constant 0 : index
    %c0_41 = arith.constant 0 : index
    %64 = vector.load %arg8[%c0_40, %c0_41] : memref<8x160xf32, #tpu.memory_space<vmem>>, vector<1x160xf32>
    %c1_42 = arith.constant 1 : index
    %c0_43 = arith.constant 0 : index
    %65 = vector.load %arg8[%c1_42, %c0_43] : memref<8x160xf32, #tpu.memory_space<vmem>>, vector<1x160xf32>
    %c2_44 = arith.constant 2 : index
    %c0_45 = arith.constant 0 : index
    %66 = vector.load %arg8[%c2_44, %c0_45] : memref<8x160xf32, #tpu.memory_space<vmem>>, vector<1x160xf32>
    %c3_46 = arith.constant 3 : index
    %c0_47 = arith.constant 0 : index
    %67 = vector.load %arg8[%c3_46, %c0_47] : memref<8x160xf32, #tpu.memory_space<vmem>>, vector<1x1xf32>
    %cst_48 = arith.constant dense<0.000000e+00> : vector<8x160xf32>
    %68 = tpu.matmul %61, %62, %cst_48 {dimension_numbers = #tpu.dot_dimension_numbers<[1], [0], [0], [1], [0, 0, 1, 1], [], []>} : vector<8x16xf32>, vector<16x160xf32>, vector<8x160xf32> -> vector<8x160xf32>
    %69 = vector.broadcast %64 : vector<1x160xf32> to vector<8x160xf32>
    %70 = arith.addf %68, %69 : vector<8x160xf32>
    %71 = tpu.iota {dimensions = array<i32: 0>} : vector<64x8xi32>
    %72 = tpu.iota {dimensions = array<i32: 1>} : vector<64x8xi32>
    %c8_i32_49 = arith.constant 8 : i32
    %73 = vector.broadcast %c8_i32_49 : i32 to vector<64x8xi32>
    %74 = arith.muli %72, %73 : vector<64x8xi32>
    %75 = arith.cmpi sge, %71, %74 : vector<64x8xi32>
    %c8_i32_50 = arith.constant 8 : i32
    %76 = vector.broadcast %c8_i32_50 : i32 to vector<64x8xi32>
    %77 = arith.addi %74, %76 : vector<64x8xi32>
    %78 = arith.cmpi slt, %71, %77 : vector<64x8xi32>
    %79 = arith.andi %75, %78 : vector<64x8xi1>
    %cst_51 = arith.constant 1.000000e+00 : f32
    %cst_52 = arith.constant 0.000000e+00 : f32
    %80 = vector.broadcast %cst_51 : f32 to vector<64x8xf32>
    %81 = vector.broadcast %cst_52 : f32 to vector<64x8xf32>
    %82 = arith.select %79, %80, %81 : vector<64x8xi1>, vector<64x8xf32>
    %cst_53 = arith.constant dense<0.000000e+00> : vector<64x160xf32>
    %83 = tpu.matmul %82, %70, %cst_53 {dimension_numbers = #tpu.dot_dimension_numbers<[1], [0], [0], [1], [0, 0, 1, 1], [], []>} : vector<64x8xf32>, vector<8x160xf32>, vector<64x160xf32> -> vector<64x160xf32>
    %cst_54 = arith.constant dense<0.000000e+00> : vector<64x160xf32>
    %84 = tpu.matmul %5, %63, %cst_54 {dimension_numbers = #tpu.dot_dimension_numbers<[1], [0], [0], [1], [0, 0, 1, 1], [], []>} : vector<64x4xf32>, vector<4x160xf32>, vector<64x160xf32> -> vector<64x160xf32>
    %85 = arith.addf %84, %83 : vector<64x160xf32>
    %cst_55 = arith.constant 0.000000e+00 : f32
    %86 = vector.broadcast %cst_55 : f32 to vector<64x160xf32>
    %87 = arith.maximumf %85, %86 : vector<64x160xf32>
    %c0_56 = arith.constant 0 : index
    %c0_57 = arith.constant 0 : index
    %88 = vector.load %arg7[%c0_56, %c0_57] : memref<160x160xf32, #tpu.memory_space<vmem>>, vector<160x160xf32>
    %cst_58 = arith.constant dense<0.000000e+00> : vector<64x160xf32>
    %89 = tpu.matmul %87, %88, %cst_58 {dimension_numbers = #tpu.dot_dimension_numbers<[1], [0], [0], [1], [0, 0, 1, 1], [], []>} : vector<64x160xf32>, vector<160x160xf32>, vector<64x160xf32> -> vector<64x160xf32>
    %90 = vector.broadcast %65 : vector<1x160xf32> to vector<64x160xf32>
    %91 = arith.addf %89, %90 : vector<64x160xf32>
    %cst_59 = arith.constant 0.000000e+00 : f32
    %92 = vector.broadcast %cst_59 : f32 to vector<64x160xf32>
    %93 = arith.maximumf %91, %92 : vector<64x160xf32>
    %94 = vector.broadcast %66 : vector<1x160xf32> to vector<64x160xf32>
    %95 = arith.mulf %93, %94 : vector<64x160xf32>
    %96 = vector.shape_cast %95 : vector<64x160xf32> to vector<8x8x160xf32>
    %cst_60 = arith.constant dense<0.000000e+00> : vector<8x8xf32>
    %97 = vector.multi_reduction <add>, %96, %cst_60 [2] : vector<8x8x160xf32> to vector<8x8xf32>
    %98 = vector.broadcast %67 : vector<1x1xf32> to vector<8x8xf32>
    %99 = arith.addf %97, %98 : vector<8x8xf32>
    %c0_61 = arith.constant 0 : index
    %c0_62 = arith.constant 0 : index
    %100 = vector.load %arg9[%c0_61, %c0_62] : memref<8x8xf32, #tpu.memory_space<vmem>>, vector<8x8xf32>
    tpu.vector_store %arg9[%c0_61, %c0_62], %99 {strides = array<i32>} : memref<8x8xf32, #tpu.memory_space<vmem>>, vector<8x8xf32>,
    return
  }
  func.func @transform_0(%arg0: i32) -> (i32, i32, i32) {
    %c0_i32 = arith.constant 0 : i32
    %c0_i32_0 = arith.constant 0 : i32
    %c0_i32_1 = arith.constant 0 : i32
    return %arg0, %c0_i32, %c0_i32_0 : i32, i32, i32
  }
  func.func @transform_1(%arg0: i32) -> (i32, i32, i32) {
    %c0_i32 = arith.constant 0 : i32
    %c0_i32_0 = arith.constant 0 : i32
    %c0_i32_1 = arith.constant 0 : i32
    return %arg0, %c0_i32, %c0_i32_0 : i32, i32, i32
  }
  func.func @transform_2(%arg0: i32) -> (i32, i32, i32) {
    %c0_i32 = arith.constant 0 : i32
    %c0_i32_0 = arith.constant 0 : i32
    %c0_i32_1 = arith.constant 0 : i32
    return %arg0, %c0_i32, %c0_i32_0 : i32, i32, i32
  }
  func.func @transform_3(%arg0: i32) -> (i32, i32) {
    %c0_i32 = arith.constant 0 : i32
    %c0_i32_0 = arith.constant 0 : i32
    %c0_i32_1 = arith.constant 0 : i32
    return %c0_i32, %c0_i32_0 : i32, i32
  }
  func.func @transform_4(%arg0: i32) -> (i32, i32) {
    %c0_i32 = arith.constant 0 : i32
    %c0_i32_0 = arith.constant 0 : i32
    %c0_i32_1 = arith.constant 0 : i32
    return %c0_i32, %c0_i32_0 : i32, i32
  }
  func.func @transform_5(%arg0: i32) -> (i32, i32) {
    %c0_i32 = arith.constant 0 : i32
    %c0_i32_0 = arith.constant 0 : i32
    %c0_i32_1 = arith.constant 0 : i32
    return %c0_i32, %c0_i32_0 : i32, i32
  }
  func.func @transform_6(%arg0: i32) -> (i32, i32) {
    %c0_i32 = arith.constant 0 : i32
    %c0_i32_0 = arith.constant 0 : i32
    %c0_i32_1 = arith.constant 0 : i32
    return %c0_i32, %c0_i32_0 : i32, i32
  }
  func.func @transform_7(%arg0: i32) -> (i32, i32) {
    %c0_i32 = arith.constant 0 : i32
    %c0_i32_0 = arith.constant 0 : i32
    %c0_i32_1 = arith.constant 0 : i32
    return %c0_i32, %c0_i32_0 : i32, i32
  }
  func.func @transform_8(%arg0: i32) -> (i32, i32) {
    %c0_i32 = arith.constant 0 : i32
    %c0_i32_0 = arith.constant 0 : i32
    return %arg0, %c0_i32 : i32, i32
  }
}

</mosaic_0001>

<bundles_post_ra>
// kernel: tpu_custom_call.1
= control target key start
LH: loop header
LB: loop body
LE: loop exit
PB: predicated region body
PF: predicated region fallthrough
CT: control target
= control target key end

     0   :  { %s2327_s27 = smov 0   ;;  %s2758_s0 = inlined_call_operand.vmem [shape: f32[16,8,4], index: 0, kind: input, shape index: {}]   ;;  %s2759_s1 = inlined_call_operand.vmem [shape: f32[16,8,1], index: 1, kind: input, shape index: {}]   ;;  %s2760_s2 = inlined_call_operand.vmem [shape: f32[16,8,4], index: 2, kind: input, shape index: {}]   ;;  %s2761_s3 = inlined_call_operand.vmem [shape: f32[96,16], index: 3, kind: input, shape index: {}]   ;;  %s2762_s4 = inlined_call_operand.vmem [shape: f32[8,16], index: 4, kind: input, shape index: {}]   ;;  %s2763_s5 = inlined_call_operand.vmem [shape: f32[24,160], index: 5, kind: input, shape index: {}]   ;;  %s2764_s6 = inlined_call_operand.vmem [shape: f32[160,160], index: 6, kind: input, shape index: {}]   ;;  %s2765_s7 = inlined_call_operand.vmem [shape: f32[8,160], index: 7, kind: input, shape index: {}]   ;;  %s2766_s8 = inlined_call_operand.vmem [shape: f32[16,8], index: 8, kind: output, shape index: {}]  }
   0x1 LB: > { %s2333_s28 = sadd.s32 4294967295, %s2276_s27   ;;  %p1983_p0 = scmp.ge.s32.totalorder %s2276_s27, 1  ;;  %s2276_s27 = sphi %s2327_s27, %s18_s27  }
   0x2   : > { %p285_p1 = scmp.lt.s32.totalorder %s2276_s27, 3 }
   0x4   : > { %p286_p2 = pnand %p1983_p0, %p285_p1 }
   0x5   : > { %v374_v0 = vld [vmem:[%s2761_s3] sm:$0xf] (!%p286_p2)  ;;  %vm469_vm0 = vcmask (!%p286_p2), 1043456   ;;  %s1984_s9 = sshll.u32 (!%p286_p2), %s2333_s28, 3  ;;  %v2278_v1 = vmov (!%p286_p2), 0   ;;  %vm444_vm1 = vcmask (!%p286_p2), 31744  }
   0x6   : > { %289 = sbr.rel (%p286_p2) target bundleno = 2413 (0x96d), region = 52  ;;  %2091 = vmatprep.subr.msk.mxu0 (!%p286_p2), %vm469_vm0, %v374_v0  ;;  %p329_p3 = scmp.lt.s32.totalorder (!%p286_p2), %s1984_s9, 15  ;;  %2268 = vset.pattern.permute.xlu0 (!%p286_p2), %v2278_v1  ;;  %v376_v18 = vld [vmem:[%s2761_s3 + $0x10] sm:$0xff] (!%p286_p2)  ;;  %v377_v19 = vld [vmem:[%s2761_s3 + $0x18] sm:$0xff] (!%p286_p2)  ;;  %v1991_v23 = vld [vmem:[%s2761_s3 + $0x8] ss:$0 sm:$0xff] (!%p286_p2) }
   0x7   : > { %2092 = vmatpush3.msk.msra.mxu0 (!%p286_p2), %vm469_vm0, %v374_v0  ;;  %2269 = vset.pattern.permute.xlu1 (!%p286_p2), %v2278_v1  ;;  %v2168_v20 = vpack.c.bf16 (!%p286_p2), %v377_v19, %v376_v18  ;;  %v2001_v28 = vld [vmem:[%s2762_s4] ss:$0 sm:$0xff] (!%p286_p2)  ;;  %vm602_vm2 = vcmask (!%p286_p2), 130048   ;;  %vm2280_vm3 = vmmov (!%p286_p2), 0   ;;  %vm750_vm7 = vcmask (!%p286_p2), 523264   ;;  %p346_p4 = scmp.lt.s32.totalorder (!%p286_p2), %s2333_s28, 1 }
   0x8   : > { %vm1272_vm13 = vcmask (!%p286_p2), 64512  }
   0x9   : > { %2169 = vmatprep.subr.bf16.mxu1 (!%p286_p2), %v2168_v20 }
   0xa   : > { %2171 = vmatpush3.bf16.msra.mxu1 (!%p286_p2), %v2168_v20 }
   0xd   : > { %s2768_s9 = smov (!%p329_p3, %s1984_s9), 15  ;;  %s2770_s28 = smov (!%p346_p4, %s2333_s28), 1 }
   0xe   : > { %s2343_s10 = sshll.u32 %s2768_s9, 3  ;;  %s1990_s20 = sshll.u32 %s2770_s28, 3 }
   0xf   : > { %s332_s13 = scalar_lea.vmem %s2758_s0, %s2343_s10  ;;  %s338_s16 = scalar_lea.vmem %s2759_s1, %s2343_s10 }
  0x10   : > { %v350_v2 = vld [vmem:[%s332_s13] sm:$0xff]  ;;  %v351_v3 = vld [vmem:[%s332_s13 + $0x8] sm:$0xff]  ;;  %v352_v4 = vld [vmem:[%s332_s13 + $0x10] sm:$0xff]  ;;  %s344_s25 = scalar_lea.vmem %s2760_s2, %s2343_s10  ;;  %s349_s23 = scalar_lea.vmem %s2766_s8, %s1990_s20 }
  0x11   : > { %2093 = vmatprep.mubr.msk.f32.mxu0 %vm444_vm1, %v350_v2  ;;  %v358_v5 = vld [vmem:[%s338_s16] sm:$0xff]  ;;  %v353_v6 = vld [vmem:[%s332_s13 + $0x18] sm:$0xff]  ;;  %v360_v7 = vld [vmem:[%s338_s16 + $0x10] sm:$0xff] }
  0x12   : > { %2094 = vmatmul.mubr.msk.f32.vlgmr.msra.gmra.mrb[0].mxu0 %vm444_vm1, %v351_v3  ;;  %394 = vperm.xlu0 %2268, %v358_v5   ;;  %v354_v8 = vld [vmem:[%s332_s13 + $0x20] sm:$0xff]  ;;  %v359_v9 = vld [vmem:[%s338_s16 + $0x8] sm:$0xff]  ;;  %v361_v10 = vld [vmem:[%s338_s16 + $0x18] sm:$0xff] }
  0x13   : > { %2096 = vmatprep.mubr.msk.f32.mxu0 %vm444_vm1, %v352_v4  ;;  %404 = vperm.xlu1 %2269, %v360_v7   ;;  %v355_v11 = vld [vmem:[%s332_s13 + $0x28] sm:$0xff]  ;;  %v356_v12 = vld [vmem:[%s332_s13 + $0x30] sm:$0xff]  ;;  %v362_v13 = vld [vmem:[%s338_s16 + $0x20] sm:$0xff]  ;;  %v2279_v7 = vmov 0.0|0.0  }
  0x14   : > { %v363_v14 = vld [vmem:[%s338_s16 + $0x28] sm:$0xff]  ;;  %v357_v15 = vld [vmem:[%s332_s13 + $0x38] sm:$0xff]  ;;  %v364_v16 = vld [vmem:[%s338_s16 + $0x30] sm:$0xff]  ;;  %2172 = vmatprep.subr.bf16.mxu0 %v2279_v7  ;;  %2190 = vmatprep.subr.bf16.mxu1 %v2279_v7 }
  0x15   : > { %v365_v17 = vld [vmem:[%s338_s16 + $0x38] sm:$0xff] }
  0x16   : > { %2097 = vmatmul.mubr.msk.f32.gmra.mrb[2].mxu0 %vm444_vm1, %v353_v6  ;;  %399 = vperm.xlu0 %2268, %v359_v9   ;;  %v2002_v9 = vld [vmem:[%s2762_s4 + $0x1] ss:$0 sm:$0xff] }
  0x17   : > { %2099 = vmatprep.mubr.msk.f32.mxu0 %vm444_vm1, %v354_v8  ;;  %409 = vperm.xlu1 %2269, %v361_v10   ;;  %v2281_v8 = vmov 0.0   ;;  %v740_v10 = vlaneseq }
  0x1a   : > { %2100 = vmatmul.mubr.msk.f32.gmra.mrb[4].mxu0 %vm444_vm1, %v355_v11  ;;  %414 = vperm.xlu0 %2268, %v362_v13  }
  0x1b   : > { %2102 = vmatprep.mubr.msk.f32.mxu0 %vm444_vm1, %v356_v12  ;;  %419 = vperm.xlu1 %2269, %v363_v14  }
  0x1e   : > { %2103 = vmatmul.mubr.msk.f32.gmra.mrb[6].mxu0 %vm444_vm1, %v357_v15  ;;  %424 = vperm.xlu0 %2268, %v364_v16   ;;  %v2390_v15 = vshrl.u32 %v740_v10, 7 }
  0x1f   : > { %429 = vperm.xlu1 %2269, %v365_v17   ;;  %2137 = vmatprep.mubr.msk.f32.mxu0 %vm2280_vm3, %v2281_v8 }
  0x91   : > { %v395_v22 = vpop.permute.xlu0 %394 }
  0x92   : > { %v405_v21 = vpop.permute.xlu1 %404  ;;  %v436_v27 = vmul.f32 %v1991_v23, %v395_v22 }
  0x93   : > { %v438_v37 = vmul.f32 %v1991_v23, %v405_v21 }
  0x95   : > { %v400_v25 = vpop.permute.xlu0 %399 }
  0x96   : > { %v410_v24 = vpop.permute.xlu1 %409  ;;  %v437_v26 = vmul.f32 %v1991_v23, %v400_v25 }
  0x97   : > { %v439_v34 = vmul.f32 %v1991_v23, %v410_v24 }
  0x99   : > { %v415_v35 = vpop.permute.xlu0 %414 }
  0x9a   : > { %v420_v32 = vpop.permute.xlu1 %419  ;;  %v440_v47 = vmul.f32 %v1991_v23, %v415_v35 }
  0x9b   : > { %v441_v44 = vmul.f32 %v1991_v23, %v420_v32 }
  0x9d   : > { %v425_v51 = vpop.permute.xlu0 %424 }
  0x9e   : > { %v430_v48 = vpop.permute.xlu1 %429  ;;  %v442_v59 = vmul.f32 %v1991_v23, %v425_v51 }
  0x9f   : > { %v443_v56 = vmul.f32 %v1991_v23, %v430_v48  ;;  %v744_v23 = vmul.u32 8, %v2390_v15 }
  0xa1   : > { %v746_v32 = vadd.s32 8, %v744_v23 }
  0xe5   : > { %v2095_v29 = vpop.f32.mrb[0].mxu0 }
  0xe6   : > { %v545_v30 = vadd.f32 %v2095_v29, %v437_v26  ;;  %v539_v31 = vpop.f32.mrb[1].mxu0 }
  0xe7   : > { %v540_v33 = vadd.f32 %v539_v31, %v436_v27  ;;  %v2394_v31 = vand.u32 127, %v740_v10 }
  0xe8   : > { %v583_v36 = vadd.f32 %v2001_v28, %v545_v30 }
  0xe9   : > { %v2098_v38 = vpop.f32.mrb[2].mxu0  ;;  %v582_v39 = vadd.f32 %v2001_v28, %v540_v33  ;;  %vm745_vm4 = vcmp.ge.s32.totalorder %v2394_v31, %v744_v23  ;;  %vm747_vm5 = vcmp.lt.s32.totalorder %v2394_v31, %v746_v32  ;;  %v1578_v32 = vld [vmem:[%s2764_s6 + $0x48] sm:$0xff] }
  0xea   : > { %v555_v40 = vadd.f32 %v2098_v38, %v439_v34  ;;  %v549_v41 = vpop.f32.mrb[3].mxu0  ;;  %v591_v45 = vmax.f32 %v583_v36, 0.0  ;;  %vm748_vm6 = vmand %vm745_vm4, %vm747_vm5 }
  0xeb   : > { %v550_v42 = vadd.f32 %v549_v41, %v438_v37  ;;  %v590_v43 = vmax.f32 %v582_v39, 0.0 }
  0xec   : > { %v585_v46 = vadd.f32 %v2001_v28, %v555_v40 }
  0xed   : > { %v584_v49 = vadd.f32 %v2001_v28, %v550_v42  ;;  %v2101_v50 = vpop.f32.mrb[4].mxu0  ;;  %2109 = vmatprep.mubr.msk.f32.mxu1 %vm602_vm2, %v590_v43  ;;  %v378_v42 = vld [vmem:[%s2761_s3 + $0x20] sm:$0xff]  ;;  %v379_v43 = vld [vmem:[%s2761_s3 + $0x28] sm:$0xff] }
  0xee   : > { %v565_v52 = vadd.f32 %v2101_v50, %v441_v44  ;;  %v559_v53 = vpop.f32.mrb[5].mxu0  ;;  %2110 = vmatmul.mubr.msk.f32.vlgmr.msra.gmra.mrb[0].mxu1 %vm602_vm2, %v591_v45  ;;  %v593_v57 = vmax.f32 %v585_v46, 0.0  ;;  %v749_v45 = vsel %vm748_vm6, 0.125, %v2281_v8  ;;  %v2185_v46 = vpack.c.bf16 %v379_v43, %v378_v42  ;;  %v381_v50 = vld [vmem:[%s2761_s3 + $0x38] sm:$0xff]  ;;  %v1581_v42 = vld [vmem:[%s2764_s6 + $0x60] sm:$0xff]  ;;  %v1583_v43 = vld [vmem:[%s2764_s6 + $0x70] sm:$0xff] }
  0xef   : > { %v592_v54 = vmax.f32 %v584_v49, 0.0  ;;  %v560_v55 = vadd.f32 %v559_v53, %v440_v47  ;;  %v380_v49 = vld [vmem:[%s2761_s3 + $0x30] sm:$0xff]  ;;  %v383_v53 = vld [vmem:[%s2761_s3 + $0x48] sm:$0xff] }
  0xf0   : > { %v587_v58 = vadd.f32 %v2001_v28, %v565_v52  ;;  %v2188_v51 = vpack.c.bf16 %v381_v50, %v380_v49  ;;  %v382_v52 = vld [vmem:[%s2761_s3 + $0x40] sm:$0xff]  ;;  %v1587_v49 = vld [vmem:[%s2764_s6 + $0x90] sm:$0xff]  ;;  %v1590_v50 = vld [vmem:[%s2764_s6 + $0xa8] sm:$0xff] }
  0xf1   : > { %v586_v60 = vadd.f32 %v2001_v28, %v560_v55  ;;  %v2104_v61 = vpop.f32.mrb[6].mxu0  ;;  %2112 = vmatprep.mubr.msk.f32.mxu1 %vm602_vm2, %v592_v54  ;;  %v2191_v54 = vpack.c.bf16 %v383_v53, %v382_v52  ;;  %v2012_v55 = vld [vmem:[%s2762_s4 + $0x2] ss:$0 sm:$0xff] }
  0xf2   : > { %v575_v62 = vadd.f32 %v2104_v61, %v443_v56  ;;  %v569_v63 = vpop.f32.mrb[7].mxu0  ;;  %2113 = vmatmul.mubr.msk.f32.gmra.mrb[2].mxu1 %vm602_vm2, %v593_v57  ;;  %v595_v2 = vmax.f32 %v587_v58, 0.0 }
  0xf3   : > { %v594_v0 = vmax.f32 %v586_v60, 0.0  ;;  %v570_v1 = vadd.f32 %v569_v63, %v442_v59  ;;  %2192 = vmatpush3.bf16.msra.mxu1 %v2191_v54  ;;  %v2014_v59 = vld [vmem:[%s2762_s4 + $0x3] ss:$0 sm:$0xff] }
  0xf4   : > { %v589_v3 = vadd.f32 %v2001_v28, %v575_v62  ;;  %v1589_v54 = vld [vmem:[%s2764_s6 + $0xa0] sm:$0xff] }
  0xf5   : > { %v588_v4 = vadd.f32 %v2001_v28, %v570_v1  ;;  %2115 = vmatprep.mubr.msk.f32.mxu1 %vm602_vm2, %v594_v0  ;;  %v384_v0 = vld [vmem:[%s2761_s3 + $0x50] sm:$0xff]  ;;  %v385_v1 = vld [vmem:[%s2761_s3 + $0x58] sm:$0xff] }
  0xf6   : > { %2116 = vmatmul.mubr.msk.f32.gmra.mrb[4].mxu1 %vm602_vm2, %v595_v2  ;;  %v597_v6 = vmax.f32 %v589_v3, 0.0  ;;  %v2194_v2 = vpack.c.bf16 %v385_v1, %v384_v0  ;;  %v1135_v3 = vld [vmem:[%s2763_s5 + $0x8] sm:$0xff] }
  0xf7   : > { %v596_v5 = vmax.f32 %v588_v4, 0.0  ;;  %v1137_v4 = vld [vmem:[%s2763_s5 + $0x18] sm:$0xff] }
  0xf9   : > { %2118 = vmatprep.mubr.msk.f32.mxu1 %vm602_vm2, %v596_v5  ;;  %v2196_v5 = vpack.c.bf16 %v1137_v4, %v1135_v3  ;;  %v1599_v3 = vld [vmem:[%s2764_s6 + $0xf0] sm:$0xff]  ;;  %v1602_v4 = vld [vmem:[%s2764_s6 + $0x108] sm:$0xff] }
  0xfa   : > { %2119 = vmatmul.mubr.msk.f32.gmra.mrb[6].mxu1 %vm602_vm2, %v597_v6  ;;  %v2016_v6 = vld [vmem:[%s2762_s4 + $0x4] ss:$0 sm:$0xff] }
  0xfb   : > { %2158 = vmatprep.mubr.msk.f32.mxu1 %vm2280_vm3, %v2281_v8  ;;  %2197 = vmatprep.subr.bf16.mxu1 %v2196_v5  ;;  %v1604_v5 = vld [vmem:[%s2764_s6 + $0x118] sm:$0xff] }
 0x1c1   : > { %v2111_v11 = vpop.f32.mrb[0].mxu1 }
 0x1c2   : > { %v699_v12 = vadd.f32 %v2111_v11, %v2002_v9  ;;  %v693_v13 = vpop.f32.mrb[1].mxu1 }
 0x1c3   : > { %v694_v14 = vadd.f32 %v2002_v9, %v693_v13  ;;  %v1136_v13 = vld [vmem:[%s2763_s5 + $0x10] sm:$0xff] }
 0x1c4   : > { %v733_v16 = vmax.f32 %v699_v12, 0.0  ;;  %v1134_v12 = vld [vmem:[%s2763_s5] sm:$0xff] }
 0x1c5   : > { %v732_v17 = vmax.f32 %v694_v14, 0.0  ;;  %v2114_v18 = vpop.f32.mrb[2].mxu1  ;;  %v2198_v14 = vpack.c.bf16 %v1136_v13, %v1134_v12  ;;  %v2574_v12 = vmul.u32 8, %v2394_v31 }
 0x1c6   : > { %v709_v19 = vadd.f32 %v2114_v18, %v2002_v9  ;;  %v703_v20 = vpop.f32.mrb[3].mxu1 }
 0x1c7   : > { %v2173_v21 = vpack.c.bf16 %v733_v16, %v732_v17  ;;  %v704_v22 = vadd.f32 %v2002_v9, %v703_v20  ;;  %v2018_v16 = vld [vmem:[%s2762_s4 + $0x5] ss:$0 sm:$0xff]  ;;  %v1570_v20 = vld [vmem:[%s2764_s6 + $0x8] sm:$0xff]  ;;  %v2577_v13 = vadd.s32 8, %v2574_v12  ;;  %vm1239_vm8 = vcmp.ge.s32.totalorder %v2390_v15, %v2574_v12 }
 0x1c8   : > { %v735_v24 = vmax.f32 %v709_v19, 0.0 }
 0x1c9   : > { %v734_v25 = vmax.f32 %v704_v22, 0.0  ;;  %v2117_v26 = vpop.f32.mrb[4].mxu1  ;;  %2174 = vmatpush3.bf16.msra.mxu0 %v2173_v21  ;;  %v1572_v21 = vld [vmem:[%s2764_s6 + $0x18] sm:$0xff]  ;;  %v1569_v22 = vld [vmem:[%s2764_s6] sm:$0xff]  ;;  %vm1248_vm9 = vcmp.lt.s32.totalorder %v2390_v15, %v2577_v13 }
 0x1ca   : > { %v719_v27 = vadd.f32 %v2117_v26, %v2002_v9  ;;  %v713_v28 = vpop.f32.mrb[5].mxu1  ;;  %2175 = vmatprep.subr.bf16.mxu0 %v2279_v7  ;;  %v2200_v23 = vpack.c.bf16 %v1572_v21, %v1570_v20  ;;  %v1576_v26 = vld [vmem:[%s2764_s6 + $0x38] sm:$0xff]  ;;  %vm1256_vm10 = vmand %vm1239_vm8, %vm1248_vm9 }
 0x1cb   : > { %v2176_v29 = vpack.c.bf16 %v735_v24, %v734_v25  ;;  %v714_v30 = vadd.f32 %v2002_v9, %v713_v28  ;;  %v1571_v24 = vld [vmem:[%s2764_s6 + $0x10] sm:$0xff]  ;;  %v1574_v25 = vld [vmem:[%s2764_s6 + $0x28] sm:$0xff] }
 0x1cc   : > { %v737_v33 = vmax.f32 %v719_v27, 0.0  ;;  %v2202_v27 = vpack.c.bf16 %v1571_v24, %v1569_v22  ;;  %v2204_v28 = vpack.c.bf16 %v1576_v26, %v1574_v25  ;;  %v1264_v26 = vsel %vm1256_vm10, 1.0, %v2281_v8 }
 0x1cd   : > { %v736_v34 = vmax.f32 %v714_v30, 0.0  ;;  %v2120_v35 = vpop.f32.mrb[6].mxu1  ;;  %2177 = vmatpush3.bf16.msra.mxu0 %v2176_v29  ;;  %v1573_v29 = vld [vmem:[%s2764_s6 + $0x20] sm:$0xff]  ;;  %v1575_v30 = vld [vmem:[%s2764_s6 + $0x30] sm:$0xff] }
 0x1ce   : > { %v729_v36 = vadd.f32 %v2120_v35, %v2002_v9  ;;  %v723_v37 = vpop.f32.mrb[7].mxu1  ;;  %2178 = vmatprep.subr.bf16.mxu0 %v2279_v7 }
 0x1cf   : > { %v2179_v38 = vpack.c.bf16 %v737_v33, %v736_v34  ;;  %v724_v39 = vadd.f32 %v2002_v9, %v723_v37  ;;  %v1580_v33 = vld [vmem:[%s2764_s6 + $0x58] sm:$0xff]  ;;  %v2206_v34 = vpack.c.bf16 %v1575_v30, %v1573_v29  ;;  %v1579_v37 = vld [vmem:[%s2764_s6 + $0x50] sm:$0xff]  ;;  %v1233_v29 = vadd.s32 24, %v2390_v15 }
 0x1d0   : > { %v739_v40 = vmax.f32 %v729_v36, 0.0  ;;  %v2208_v35 = vpack.c.bf16 %v1580_v33, %v1578_v32  ;;  %v1577_v36 = vld [vmem:[%s2764_s6 + $0x40] sm:$0xff]  ;;  %v1234_v32 = vadd.s32 32, %v2390_v15 }
 0x1d1   : > { %v738_v41 = vmax.f32 %v724_v39, 0.0  ;;  %2180 = vmatpush3.bf16.msra.mxu0 %v2179_v38  ;;  %v1582_v38 = vld [vmem:[%s2764_s6 + $0x68] sm:$0xff]  ;;  %v1584_v39 = vld [vmem:[%s2764_s6 + $0x78] sm:$0xff]  ;;  %vm1242_vm4 = vcmp.ge.s32.totalorder %v1233_v29, %v2574_v12  ;;  %vm1251_vm5 = vcmp.lt.s32.totalorder %v1233_v29, %v2577_v13 }
 0x1d2   : > { %2181 = vmatprep.subr.bf16.mxu0 %v2279_v7  ;;  %vm1259_vm6 = vmand %vm1242_vm4, %vm1251_vm5  ;;  %vm1886_vm5 = vcmask 1041409  }
 0x1d3   : > { %v2182_v44 = vpack.c.bf16 %v739_v40, %v738_v41  ;;  %v2210_v40 = vpack.c.bf16 %v1579_v37, %v1577_v36  ;;  %v2212_v41 = vpack.c.bf16 %v1584_v39, %v1582_v38  ;;  %v1236_v36 = vadd.s32 48, %v2390_v15 }
 0x1d4   : > { %v1237_v38 = vadd.s32 56, %v2390_v15 }
 0x1d5   : > { %2183 = vmatpush3.bf16.msra.mxu0 %v2182_v44  ;;  %v1586_v44 = vld [vmem:[%s2764_s6 + $0x88] sm:$0xff] }
 0x1d6   : > { %2184 = vmatprep.subr.bf16.mxu0 %v2279_v7 }
 0x1d8   : > { %2138 = vmatmul.mubr.msk.f32.vlgmr.msra.gmra.mrb[8].mxu0 %vm750_vm7, %v749_v45  ;;  %v1588_v45 = vld [vmem:[%s2764_s6 + $0x98] sm:$0xff]  ;;  %vm1243_vm7 = vcmp.ge.s32.totalorder %v1234_v32, %v2574_v12 }
 0x1d9   : > { %2186 = vmatpush3.bf16.msra.mxu0 %v2185_v46  ;;  %2144 = vmatprep.mubr.msk.f32.mxu0 %vm2280_vm3, %v2281_v8  ;;  %v2214_v46 = vpack.c.bf16 %v1583_v43, %v1581_v42  ;;  %v366_v42 = vld [vmem:[%s344_s25] sm:$0xff]  ;;  %v367_v43 = vld [vmem:[%s344_s25 + $0x8] sm:$0xff] }
 0x1da   : > { %2187 = vmatprep.subr.bf16.mxu0 %v2279_v7 }
 0x2ab   : > { %v820_v47 = vpop.f32.mrb[8].mxu0 }
 0x2ac   : > { %v2139_v48 = vpop.f32.mrb[9].mxu0  ;;  %2145 = vmatmul.mubr.msk.f32.vlgmr.msra.gmra.mrb[10].mxu0 %vm602_vm2, %v820_v47  ;;  %v2216_v47 = vpack.c.bf16 %v1588_v45, %v1586_v44  ;;  %v368_v44 = vld [vmem:[%s344_s25 + $0x10] sm:$0xff]  ;;  %v369_v45 = vld [vmem:[%s344_s25 + $0x18] sm:$0xff] }
 0x2ad   : > { %2151 = vmatprep.mubr.msk.f32.mxu0 %vm2280_vm3, %v2281_v8  ;;  %2189 = vmatpush3.bf16.msra.mxu0 %v2188_v51  ;;  %v1585_v48 = vld [vmem:[%s2764_s6 + $0x80] sm:$0xff]  ;;  %v1592_v51 = vld [vmem:[%s2764_s6 + $0xb8] sm:$0xff] }
 0x2ae   : > { %2193 = vmatprep.subr.bf16.mxu0 %v2279_v7  ;;  %v2218_v52 = vpack.c.bf16 %v1587_v49, %v1585_v48  ;;  %v2220_v53 = vpack.c.bf16 %v1592_v51, %v1590_v50  ;;  %v372_v48 = vld [vmem:[%s344_s25 + $0x30] sm:$0xff]  ;;  %v373_v49 = vld [vmem:[%s344_s25 + $0x38] sm:$0xff]  ;;  %v1606_v50 = vld [vmem:[%s2764_s6 + $0x128] sm:$0xff] }
 0x2af   : > { %v1608_v51 = vld [vmem:[%s2764_s6 + $0x138] sm:$0xff] }
 0x37f   : > { %v897_v56 = vpop.f32.mrb[10].mxu0 }
 0x380   : > { %v898_v57 = vadd.f32 %v2012_v55, %v897_v56  ;;  %v2146_v58 = vpop.f32.mrb[11].mxu0  ;;  %v1591_v55 = vld [vmem:[%s2764_s6 + $0xb0] sm:$0xff]  ;;  %v1594_v56 = vld [vmem:[%s2764_s6 + $0xc8] sm:$0xff] }
 0x381   : > { %v2222_v58 = vpack.c.bf16 %v1591_v55, %v1589_v54 }
 0x382   : > { %2152 = vmatmul.mubr.msk.f32.vlgmr.msra.gmra.mrb[12].mxu0 %vm602_vm2, %v898_v57  ;;  %v1596_v57 = vld [vmem:[%s2764_s6 + $0xd8] sm:$0xff] }
 0x383   : > { %2165 = vmatprep.mubr.msk.f32.mxu0 %vm2280_vm3, %v2281_v8  ;;  %2195 = vmatpush3.bf16.msra.mxu0 %v2194_v2  ;;  %v1597_v2 = vld [vmem:[%s2764_s6 + $0xe0] sm:$0xff] }
 0x455   : > { %v974_v60 = vpop.f32.mrb[12].mxu0 }
 0x456   : > { %v975_v61 = vadd.f32 %v2014_v59, %v974_v60  ;;  %v2153_v62 = vpop.f32.mrb[13].mxu0  ;;  %v2224_v59 = vpack.c.bf16 %v1596_v57, %v1594_v56  ;;  %v1593_v60 = vld [vmem:[%s2764_s6 + $0xc0] sm:$0xff] }
 0x457   : > { %v1598_v62 = vld [vmem:[%s2764_s6 + $0xe8] sm:$0xff] }
 0x458   : > { %v978_v63 = vmax.f32 %v975_v61, 0.0  ;;  %v1595_v61 = vld [vmem:[%s2764_s6 + $0xd0] sm:$0xff] }
 0x459   : > { %v2226_v0 = vpack.c.bf16 %v1595_v61, %v1593_v60 }
 0x45a   : > { %2159 = vmatmul.mubr.msk.f32.vlgmr.msra.gmra.mrb[8].mxu1 %vm602_vm2, %v978_v63  ;;  %v1600_v63 = vld [vmem:[%s2764_s6 + $0xf8] sm:$0xff] }
 0x45b   : > { %1224 = vmatprep.mubr.f32.mxu1 %v2281_v8  ;;  %2199 = vmatpush1.bf16.msra.mxu1 %v2198_v14  ;;  %v2228_v1 = vpack.c.bf16 %v1600_v63, %v1598_v62  ;;  %v2580_v14 = vsub.s32 1, %v2390_v15 }
 0x45c   : > { %2201 = vmatprep.subr.bf16.mxu1 %v2200_v23  ;;  %v1232_v23 = vadd.s32 16, %v2390_v15 }
 0x45e   : > { %vm1241_vm15 = vcmp.ge.s32.totalorder %v1232_v23, %v2574_v12 }
 0x52d   : > { %v1052_v7 = vpop.f32.mrb[8].mxu1 }
 0x52e   : > { %v1053_v9 = vadd.f32 %v2016_v6, %v1052_v7  ;;  %v2160_v10 = vpop.f32.mrb[9].mxu1  ;;  %v2230_v6 = vpack.c.bf16 %v1599_v3, %v1597_v2  ;;  %v2232_v7 = vpack.c.bf16 %v1604_v5, %v1602_v4 }
 0x52f   : > { %v1603_v10 = vld [vmem:[%s2764_s6 + $0x110] sm:$0xff] }
 0x530   : > { %v1056_v11 = vmax.f32 %v1053_v9, 0.0  ;;  %v1601_v9 = vld [vmem:[%s2764_s6 + $0x100] sm:$0xff] }
 0x532   : > { %2166 = vmatmul.mubr.msk.f32.vlgmr.msra.gmra.mrb[14].mxu0 %vm602_vm2, %v1056_v11  ;;  %v2234_v11 = vpack.c.bf16 %v1603_v10, %v1601_v9 }
 0x533   : > { %1361 = vmatprep.mubr.f32.mxu0 %v2281_v8 }
 0x605   : > { %v1130_v17 = vpop.f32.mrb[14].mxu0 }
 0x606   : > { %v1131_v18 = vadd.f32 %v2018_v16, %v1130_v17  ;;  %v2167_v19 = vpop.f32.mrb[15].mxu0  ;;  %v1140_v16 = vld [vmem:[%s2765_s7] ss:$8 sm:$0x3]  ;;  %v2586_v17 = vsub.s32 0, %v2390_v15 }
 0x607   : > { %v1154_v19 = vrot.slane %v1140_v16, %v2580_v14 }
 0x608   : > { %2022 = vmatmul.mubr.msk.f32.vlgmr.msra.gmra.mrb[10].mxu1 %vm602_vm2, %v1131_v18  ;;  %v1231_v18 = vadd.s32 8, %v2390_v15  ;;  %v1150_v20 = vrot.slane %v1140_v16, %v2586_v17  ;;  %vm1250_vm2 = vcmp.lt.s32.totalorder %v1232_v23, %v2577_v13 }
 0x609   : > { %2203 = vmatpush1.bf16.msra.mxu1 %v2202_v27  ;;  %v1139_v27 = vld [vmem:[%s2763_s5 + $0x28] sm:$0xf]  ;;  %vm1258_vm3 = vmand %vm1241_vm15, %vm1250_vm2  ;;  %vm1246_vm2 = vcmp.ge.s32.totalorder %v1237_v38, %v2574_v12 }
 0x60a   : > { %2205 = vmatprep.subr.bf16.mxu1 %v2204_v28  ;;  %vm1240_vm11 = vcmp.ge.s32.totalorder %v1231_v18, %v2574_v12  ;;  %vm1249_vm12 = vcmp.lt.s32.totalorder %v1231_v18, %v2577_v13  ;;  %v1138_v28 = vld [vmem:[%s2763_s5 + $0x20] sm:$0xf]  ;;  %v1266_v33 = vsel %vm1258_vm3, 1.0, %v2281_v8  ;;  %vm1255_vm3 = vcmp.lt.s32.totalorder %v1237_v38, %v2577_v13 }
 0x60b   : > { %vm1257_vm14 = vmand %vm1240_vm11, %vm1249_vm12  ;;  %vm1245_vm12 = vcmp.ge.s32.totalorder %v1236_v36, %v2574_v12 }
 0x60c   : > { %v1265_v30 = vsel %vm1257_vm14, 1.0, %v2281_v8  ;;  %vm1254_vm14 = vcmp.lt.s32.totalorder %v1236_v36, %v2577_v13  ;;  %vm1263_vm4 = vmand %vm1246_vm2, %vm1255_vm3 }
 0x60d   : > { %2207 = vmatpush1.bf16.msra.mxu1 %v2206_v34  ;;  %v1235_v34 = vadd.s32 40, %v2390_v15  ;;  %vm1262_vm15 = vmand %vm1245_vm12, %vm1254_vm14 }
 0x60e   : > { %2209 = vmatprep.subr.bf16.mxu1 %v2208_v35  ;;  %v1267_v35 = vsel %vm1259_vm6, 1.0, %v2281_v8  ;;  %vm1888_vm6 = vcmask 1042434  }
 0x60f   : > { %vm1244_vm9 = vcmp.ge.s32.totalorder %v1235_v34, %v2574_v12  ;;  %vm1253_vm10 = vcmp.lt.s32.totalorder %v1235_v34, %v2577_v13 }
 0x610   : > { %vm1261_vm11 = vmand %vm1244_vm9, %vm1253_vm10  ;;  %vm1896_vm9 = vcmask 1046534   ;;  %vm1898_vm10 = vcmask 1047559  }
 0x611   : > { %2211 = vmatpush1.bf16.msra.mxu1 %v2210_v40  ;;  %v1269_v39 = vsel %vm1261_vm11, 1.0, %v2281_v8  ;;  %v1270_v40 = vsel %vm1262_vm15, 1.0, %v2281_v8 }
 0x612   : > { %2213 = vmatprep.subr.bf16.mxu1 %v2212_v41  ;;  %v1271_v41 = vsel %vm1263_vm4, 1.0, %v2281_v8 }
 0x615   : > { %2215 = vmatpush1.bf16.msra.mxu1 %v2214_v46  ;;  %v370_v46 = vld [vmem:[%s344_s25 + $0x20] sm:$0xff] }
 0x616   : > { %2217 = vmatprep.subr.bf16.mxu1 %v2216_v47  ;;  %v371_v47 = vld [vmem:[%s344_s25 + $0x28] sm:$0xff] }
 0x619   : > { %2219 = vmatpush1.bf16.msra.mxu1 %v2218_v52  ;;  %v2236_v52 = vpack.c.bf16 %v1608_v51, %v1606_v50 }
 0x61a   : > { %2221 = vmatprep.subr.bf16.mxu1 %v2220_v53  ;;  %v1605_v53 = vld [vmem:[%s2764_s6 + $0x120] sm:$0xff] }
 0x61d   : > { %2223 = vmatpush1.bf16.msra.mxu1 %v2222_v58 }
 0x61e   : > { %2225 = vmatprep.subr.bf16.mxu1 %v2224_v59 }
 0x621   : > { %2227 = vmatpush1.bf16.msra.mxu1 %v2226_v0 }
 0x622   : > { %2229 = vmatprep.subr.bf16.mxu1 %v2228_v1 }
 0x625   : > { %2231 = vmatpush1.bf16.msra.mxu1 %v2230_v6 }
 0x626   : > { %2233 = vmatprep.subr.bf16.mxu1 %v2232_v7 }
 0x629   : > { %2235 = vmatpush1.bf16.msra.mxu1 %v2234_v11 }
 0x62a   : > { %2237 = vmatprep.subr.bf16.mxu1 %v2236_v52 }
 0x6db   : > { %v1226_v21 = vpop.f32.mrb[10].mxu1 }
 0x6dc   : > { %v1228_v22 = vpop.f32.mrb[11].mxu1  ;;  %v1227_v25 = vadd.f32 %v1226_v21, %v1150_v20 }
 0x6dd   : > { %v1229_v24 = vadd.f32 %v1228_v22, %v1154_v19 }
 0x6df   : > { %1297 = vmatprep.subr.mxu0 %v1229_v24 }
 0x6e0   : > { %1298 = vmatpush1.msra.mxu0 %v1227_v25 }
 0x6e1   : > { %2023 = vmatmul.mubr.msk.f32.vlgmr.msra.gmra.mrb[16].mxu0 %vm1272_vm13, %v1264_v26  ;;  %2031 = vmatprep.subr.msk.mxu0 %vm469_vm0, %v1139_v27  ;;  %v2020_v27 = vld [vmem:[%s2765_s7 + $0x1] ss:$8 sm:$0x3] }
 0x6e2   : > { %1367 = vmatprep.mubr.f32.mxu0 %v2281_v8  ;;  %2032 = vmatpush1.msk.msra.mxu0 %vm469_vm0, %v1138_v28  ;;  %vm1252_vm0 = vcmp.lt.s32.totalorder %v1234_v32, %v2577_v13  ;;  %v2690_v28 = vrot.slane %v2020_v27, %v2586_v17  ;;  %v2693_v29 = vrot.slane %v2020_v27, %v2580_v14 }
 0x6e3   : > { %vm1260_vm8 = vmand %vm1243_vm7, %vm1252_vm0  ;;  %vm1890_vm7 = vcmask 1043459   ;;  %vm1892_vm0 = vcmask 1044484  }
 0x6e4   : > { %v1268_v37 = vsel %vm1260_vm8, 1.0, %v2281_v8  ;;  %vm1894_vm8 = vcmask 1045509  }
 0x6e5   : > { %2024 = vmatmul.mubr.msk.f32.gmra.mrb[18].mxu0 %vm1272_vm13, %v1265_v30  ;;  %v2021_v30 = vld [vmem:[%s2765_s7 + $0x2] ss:$8 sm:$0x3] }
 0x6e6   : > { %1373 = vmatprep.mubr.f32.mxu0 %v2281_v8 }
 0x6e9   : > { %2025 = vmatmul.mubr.msk.f32.gmra.mrb[20].mxu0 %vm1272_vm13, %v1266_v33 }
 0x6ea   : > { %1379 = vmatprep.mubr.f32.mxu0 %v2281_v8 }
 0x6ed   : > { %2026 = vmatmul.mubr.msk.f32.gmra.mrb[22].mxu0 %vm1272_vm13, %v1267_v35  ;;  %v2700_v35 = vrot.slane %v2021_v30, %v2580_v14 }
 0x6ee   : > { %1385 = vmatprep.mubr.f32.mxu0 %v2281_v8 }
 0x6f1   : > { %2027 = vmatmul.mubr.msk.f32.gmra.mrb[24].mxu0 %vm1272_vm13, %v1268_v37  ;;  %v2704_v37 = vrot.slane %v2021_v30, %v2586_v17 }
 0x6f2   : > { %1391 = vmatprep.mubr.f32.mxu0 %v2281_v8 }
 0x6f5   : > { %2028 = vmatmul.mubr.msk.f32.gmra.mrb[26].mxu0 %vm1272_vm13, %v1269_v39 }
 0x6f6   : > { %1397 = vmatprep.mubr.f32.mxu0 %v2281_v8 }
 0x6f9   : > { %2029 = vmatmul.mubr.msk.f32.gmra.mrb[28].mxu0 %vm1272_vm13, %v1270_v40 }
 0x6fa   : > { %1403 = vmatprep.mubr.f32.mxu0 %v2281_v8 }
 0x6fd   : > { %2030 = vmatmul.mubr.msk.f32.gmra.mrb[30].mxu0 %vm1272_vm13, %v1271_v41 }
 0x6fe   : > { %1504 = vmatprep.mubr.f32.mxu0 %v2281_v8 }
 0x701   : > { %2033 = vmatmul.mubr.msk.f32.vlgmr.msra.gmra.mrb[16].mxu0 %vm444_vm1, %v366_v42 }
 0x702   : > { %1510 = vmatprep.mubr.f32.mxu0 %v2281_v8 }
 0x705   : > { %2034 = vmatmul.mubr.msk.f32.gmra.mrb[18].mxu0 %vm444_vm1, %v367_v43 }
 0x706   : > { %1516 = vmatprep.mubr.f32.mxu0 %v2281_v8 }
 0x709   : > { %2035 = vmatmul.mubr.msk.f32.gmra.mrb[20].mxu0 %vm444_vm1, %v368_v44 }
 0x70a   : > { %1522 = vmatprep.mubr.f32.mxu0 %v2281_v8 }
 0x70d   : > { %2036 = vmatmul.mubr.msk.f32.gmra.mrb[22].mxu0 %vm444_vm1, %v369_v45 }
 0x70e   : > { %1528 = vmatprep.mubr.f32.mxu0 %v2281_v8 }
 0x711   : > { %2037 = vmatmul.mubr.msk.f32.gmra.mrb[24].mxu0 %vm444_vm1, %v370_v46 }
 0x712   : > { %1534 = vmatprep.mubr.f32.mxu0 %v2281_v8 }
 0x715   : > { %2038 = vmatmul.mubr.msk.f32.gmra.mrb[26].mxu0 %vm444_vm1, %v371_v47 }
 0x716   : > { %1540 = vmatprep.mubr.f32.mxu0 %v2281_v8 }
 0x719   : > { %2039 = vmatmul.mubr.msk.f32.gmra.mrb[28].mxu0 %vm444_vm1, %v372_v48 }
 0x71a   : > { %1546 = vmatprep.mubr.f32.mxu0 %v2281_v8  ;;  %v1607_v8 = vld [vmem:[%s2764_s6 + $0x130] sm:$0xff] }
 0x71b   : > { %v2238_v54 = vpack.c.bf16 %v1607_v8, %v1605_v53 }
 0x71d   : > { %2040 = vmatmul.mubr.msk.f32.gmra.mrb[30].mxu0 %vm444_vm1, %v373_v49  ;;  %2239 = vmatpush1.bf16.msra.mxu1 %v2238_v54  ;;  %vm1620_vm1 = vcmask 261120  }
 0x7d4   : > { %v1506_v55 = vpop.f32.mrb[16].mxu0 }
 0x7d5   : > { %v1508_v56 = vpop.f32.mrb[17].mxu0  ;;  %v1553_v58 = vmax.f32 %v1506_v55, 0.0 }
 0x7d6   : > { %v1554_v57 = vmax.f32 %v1508_v56, 0.0 }
 0x7d8   : > { %v1512_v59 = vpop.f32.mrb[18].mxu0  ;;  %2041 = vmatprep.mubr.msk.f32.mxu1 %vm1620_vm1, %v1554_v57 }
 0x7d9   : > { %v1514_v60 = vpop.f32.mrb[19].mxu0  ;;  %1710 = vmatmul.mubr.f32.vlgmr.msra.gmra.mrb[12].mxu1 %v1553_v58  ;;  %v1555_v62 = vmax.f32 %v1512_v59, 0.0 }
 0x7da   : > { %v1556_v61 = vmax.f32 %v1514_v60, 0.0 }
 0x7dc   : > { %v1518_v63 = vpop.f32.mrb[20].mxu0  ;;  %2042 = vmatprep.mubr.msk.f32.mxu1 %vm1620_vm1, %v1556_v61 }
 0x7dd   : > { %v1520_v0 = vpop.f32.mrb[21].mxu0  ;;  %1716 = vmatmul.mubr.f32.gmra.mrb[14].mxu1 %v1555_v62  ;;  %v1557_v2 = vmax.f32 %v1518_v63, 0.0 }
 0x7de   : > { %v1558_v1 = vmax.f32 %v1520_v0, 0.0 }
 0x7e0   : > { %v1524_v3 = vpop.f32.mrb[22].mxu0  ;;  %2043 = vmatprep.mubr.msk.f32.mxu1 %vm1620_vm1, %v1558_v1 }
 0x7e1   : > { %v1526_v4 = vpop.f32.mrb[23].mxu0  ;;  %1722 = vmatmul.mubr.f32.gmra.mrb[16].mxu1 %v1557_v2  ;;  %v1559_v6 = vmax.f32 %v1524_v3, 0.0 }
 0x7e2   : > { %v1560_v5 = vmax.f32 %v1526_v4, 0.0 }
 0x7e4   : > { %v1530_v7 = vpop.f32.mrb[24].mxu0  ;;  %2044 = vmatprep.mubr.msk.f32.mxu1 %vm1620_vm1, %v1560_v5 }
 0x7e5   : > { %v1532_v9 = vpop.f32.mrb[25].mxu0  ;;  %1728 = vmatmul.mubr.f32.gmra.mrb[18].mxu1 %v1559_v6  ;;  %v1561_v11 = vmax.f32 %v1530_v7, 0.0 }
 0x7e6   : > { %v1562_v10 = vmax.f32 %v1532_v9, 0.0 }
 0x7e8   : > { %v1536_v12 = vpop.f32.mrb[26].mxu0  ;;  %2045 = vmatprep.mubr.msk.f32.mxu1 %vm1620_vm1, %v1562_v10 }
 0x7e9   : > { %v1538_v13 = vpop.f32.mrb[27].mxu0  ;;  %1734 = vmatmul.mubr.f32.gmra.mrb[20].mxu1 %v1561_v11  ;;  %v1563_v18 = vmax.f32 %v1536_v12, 0.0 }
 0x7ea   : > { %v1564_v16 = vmax.f32 %v1538_v13, 0.0 }
 0x7ec   : > { %v1542_v19 = vpop.f32.mrb[28].mxu0  ;;  %2046 = vmatprep.mubr.msk.f32.mxu1 %vm1620_vm1, %v1564_v16 }
 0x7ed   : > { %v1544_v20 = vpop.f32.mrb[29].mxu0  ;;  %1740 = vmatmul.mubr.f32.gmra.mrb[22].mxu1 %v1563_v18  ;;  %v1565_v22 = vmax.f32 %v1542_v19, 0.0 }
 0x7ee   : > { %v1566_v21 = vmax.f32 %v1544_v20, 0.0 }
 0x7f0   : > { %v1548_v23 = vpop.f32.mrb[30].mxu0  ;;  %2047 = vmatprep.mubr.msk.f32.mxu1 %vm1620_vm1, %v1566_v21 }
 0x7f1   : > { %v1550_v24 = vpop.f32.mrb[31].mxu0  ;;  %1746 = vmatmul.mubr.f32.gmra.mrb[24].mxu1 %v1565_v22  ;;  %v1567_v26 = vmax.f32 %v1548_v23, 0.0 }
 0x7f2   : > { %v1568_v25 = vmax.f32 %v1550_v24, 0.0 }
 0x7f4   : > { %2048 = vmatprep.mubr.msk.f32.mxu1 %vm1620_vm1, %v1568_v25 }
 0x7f5   : > { %1752 = vmatmul.mubr.f32.gmra.mrb[26].mxu1 %v1567_v26 }
 0x8ac   : > { %v1711_v32 = vpop.f32.mrb[12].mxu1 }
 0x8ad   : > { %v1712_v33 = vadd.f32 %v1711_v32, %v2690_v28  ;;  %v1713_v34 = vpop.f32.mrb[13].mxu1 }
 0x8ae   : > { %v1714_v36 = vadd.f32 %v1713_v34, %v2693_v29 }
 0x8af   : > { %v1758_v38 = vmax.f32 %v1712_v33, 0.0 }
 0x8b0   : > { %v1759_v39 = vmax.f32 %v1714_v36, 0.0  ;;  %v1717_v40 = vpop.f32.mrb[14].mxu1 }
 0x8b1   : > { %v1718_v41 = vadd.f32 %v1717_v40, %v2690_v28  ;;  %v1719_v42 = vpop.f32.mrb[15].mxu1  ;;  %v1785_v45 = vmul.f32 %v2704_v37, %v1758_v38 }
 0x8b2   : > { %v1786_v43 = vmul.f32 %v2700_v35, %v1759_v39  ;;  %v1720_v44 = vadd.f32 %v1719_v42, %v2693_v29 }
 0x8b3   : > { %v1760_v46 = vmax.f32 %v1718_v41, 0.0 }
 0x8b4   : > { %v1761_v14 = vmax.f32 %v1720_v44, 0.0  ;;  %v1723_v47 = vpop.f32.mrb[16].mxu1  ;;  %v1801_v48 = vsel %vm1620_vm1, %v1786_v43, 0.0 }
 0x8b5   : > { %v1724_v17 = vadd.f32 %v1723_v47, %v2690_v28  ;;  %v1725_v49 = vpop.f32.mrb[17].mxu1  ;;  %v1802_v50 = vadd.f32 %v1801_v48, %v1785_v45  ;;  %v1787_v53 = vmul.f32 %v2704_v37, %v1760_v46 }
 0x8b6   : > { %v1788_v51 = vmul.f32 %v2700_v35, %v1761_v14  ;;  %v1726_v52 = vadd.f32 %v1725_v49, %v2693_v29 }
 0x8b7   : > { %v1762_v8 = vmax.f32 %v1724_v17, 0.0  ;;  %1803 = vadd.xlane.f32.xlu0 %v1802_v50 }
 0x8b8   : > { %v1763_v54 = vmax.f32 %v1726_v52, 0.0  ;;  %v1729_v55 = vpop.f32.mrb[18].mxu1  ;;  %v1805_v56 = vsel %vm1620_vm1, %v1788_v51, 0.0 }
 0x8b9   : > { %v1730_v57 = vadd.f32 %v1729_v55, %v2690_v28  ;;  %v1731_v58 = vpop.f32.mrb[19].mxu1  ;;  %v1806_v59 = vadd.f32 %v1805_v56, %v1787_v53  ;;  %v1789_v62 = vmul.f32 %v2704_v37, %v1762_v8 }
 0x8ba   : > { %v1790_v60 = vmul.f32 %v2700_v35, %v1763_v54  ;;  %v1732_v61 = vadd.f32 %v1731_v58, %v2693_v29 }
 0x8bb   : > { %v1764_v63 = vmax.f32 %v1730_v57, 0.0  ;;  %1807 = vadd.xlane.f32.xlu1 %v1806_v59 }
 0x8bc   : > { %v1765_v0 = vmax.f32 %v1732_v61, 0.0  ;;  %v1735_v1 = vpop.f32.mrb[20].mxu1  ;;  %v1809_v2 = vsel %vm1620_vm1, %v1790_v60, 0.0 }
 0x8bd   : > { %v1736_v3 = vadd.f32 %v1735_v1, %v2690_v28  ;;  %v1737_v4 = vpop.f32.mrb[21].mxu1  ;;  %v1810_v5 = vadd.f32 %v1809_v2, %v1789_v62  ;;  %v1791_v9 = vmul.f32 %v2704_v37, %v1764_v63 }
 0x8be   : > { %v1792_v6 = vmul.f32 %v2700_v35, %v1765_v0  ;;  %v1738_v7 = vadd.f32 %v1737_v4, %v2693_v29 }
 0x8bf   : > { %v1766_v10 = vmax.f32 %v1736_v3, 0.0  ;;  %1811 = vadd.xlane.f32.xlu0 %v1810_v5 }
 0x8c0   : > { %v1767_v11 = vmax.f32 %v1738_v7, 0.0  ;;  %v1741_v12 = vpop.f32.mrb[22].mxu1  ;;  %v1813_v13 = vsel %vm1620_vm1, %v1792_v6, 0.0 }
 0x8c1   : > { %v1742_v16 = vadd.f32 %v1741_v12, %v2690_v28  ;;  %v1743_v18 = vpop.f32.mrb[23].mxu1  ;;  %v1814_v19 = vadd.f32 %v1813_v13, %v1791_v9  ;;  %v1793_v22 = vmul.f32 %v2704_v37, %v1766_v10 }
 0x8c2   : > { %v1794_v20 = vmul.f32 %v2700_v35, %v1767_v11  ;;  %v1744_v21 = vadd.f32 %v1743_v18, %v2693_v29 }
 0x8c3   : > { %v1768_v23 = vmax.f32 %v1742_v16, 0.0  ;;  %1815 = vadd.xlane.f32.xlu0 %v1814_v19 }
 0x8c4   : > { %v1769_v24 = vmax.f32 %v1744_v21, 0.0  ;;  %v1747_v25 = vpop.f32.mrb[24].mxu1  ;;  %v1817_v26 = vsel %vm1620_vm1, %v1794_v20, 0.0 }
 0x8c5   : > { %v1748_v27 = vadd.f32 %v1747_v25, %v2690_v28  ;;  %v1749_v30 = vpop.f32.mrb[25].mxu1  ;;  %v1818_v32 = vadd.f32 %v1817_v26, %v1793_v22  ;;  %v1795_v36 = vmul.f32 %v2704_v37, %v1768_v23 }
 0x8c6   : > { %v1796_v33 = vmul.f32 %v2700_v35, %v1769_v24  ;;  %v1750_v34 = vadd.f32 %v1749_v30, %v2693_v29 }
 0x8c7   : > { %v1770_v38 = vmax.f32 %v1748_v27, 0.0  ;;  %1819 = vadd.xlane.f32.xlu1 %v1818_v32 }
 0x8c8   : > { %v1771_v39 = vmax.f32 %v1750_v34, 0.0  ;;  %v1753_v40 = vpop.f32.mrb[26].mxu1  ;;  %v1821_v41 = vsel %vm1620_vm1, %v1796_v33, 0.0 }
 0x8c9   : > { %v1754_v42 = vadd.f32 %v1753_v40, %v2690_v28  ;;  %v1755_v43 = vpop.f32.mrb[27].mxu1  ;;  %v1822_v44 = vadd.f32 %v1821_v41, %v1795_v36  ;;  %v1797_v14 = vmul.f32 %v2704_v37, %v1770_v38 }
 0x8ca   : > { %v1798_v45 = vmul.f32 %v2700_v35, %v1771_v39  ;;  %v1756_v46 = vadd.f32 %v1755_v43, %v2693_v29  ;;  %v1145_v29 = vld [vmem:[%s2765_s7 + $0x3] ss:$0 sm:$0xff] }
 0x8cb   : > { %v1772_v47 = vmax.f32 %v1754_v42, 0.0  ;;  %1823 = vadd.xlane.f32.xlu0 %v1822_v44 }
 0x8cc   : > { %v1773_v48 = vmax.f32 %v1756_v46, 0.0  ;;  %v1825_v17 = vsel %vm1620_vm1, %v1798_v45, 0.0 }
 0x8cd   : > { %v1826_v49 = vadd.f32 %v1825_v17, %v1797_v14  ;;  %v1799_v51 = vmul.f32 %v2704_v37, %v1772_v47  ;;  %v1856_v37 = vsub.s32 %v2394_v31, %v2390_v15 }
 0x8ce   : > { %v1800_v50 = vmul.f32 %v2700_v35, %v1773_v48 }
 0x8cf   : > { %1827 = vadd.xlane.f32.xlu1 %v1826_v49 }
 0x8d0   : > { %v1829_v28 = vsel %vm1620_vm1, %v1800_v50, 0.0 }
 0x8d1   : > { %v1830_v52 = vadd.f32 %v1829_v28, %v1799_v51 }
 0x8d3   : > { %1831 = vadd.xlane.f32.xlu0 %v1830_v52 }
 0x8e0   : > { %1835 = vperm.xlu1 %2269, %v1145_v29  }
 0x944   : > { %v1804_v53 = vpop.xlane.xlu0 %1803 }
 0x948   : > { %v1808_v8 = vpop.xlane.xlu1 %1807 }
 0x94c   : > { %v1812_v54 = vpop.xlane.xlu0 %1811 }
 0x950   : > { %v1816_v56 = vpop.xlane.xlu0 %1815 }
 0x954   : > { %v1820_v55 = vpop.xlane.xlu1 %1819 }
 0x958   : > { %v1824_v35 = vpop.xlane.xlu0 %1823 }
 0x95c   : > { %v1828_v57 = vpop.xlane.xlu1 %1827 }
 0x960   : > { %v1836_v58 = vpop.permute.xlu1 %1835  ;;  %v1832_v0 = vpop.xlane.xlu0 %1831 }
 0x961   : > { %v1838_v59 = vadd.f32 %v1836_v58, %v1804_v53  ;;  %v1839_v60 = vadd.f32 %v1836_v58, %v1808_v8  ;;  %v1840_v61 = vadd.f32 %v1836_v58, %v1812_v54  ;;  %v1841_v62 = vadd.f32 %v1836_v58, %v1816_v56 }
 0x962   : > { %v1842_v63 = vadd.f32 %v1836_v58, %v1820_v55  ;;  %v1843_v1 = vadd.f32 %v1836_v58, %v1824_v35  ;;  %v1844_v5 = vadd.f32 %v1836_v58, %v1828_v57  ;;  %v1845_v15 = vadd.f32 %v1836_v58, %v1832_v0 }
 0x963   : > { %v1857_v2 = vrot.slane %v1838_v59, %v1856_v37  ;;  %v1861_v3 = vrot.slane %v1839_v60, %v1856_v37  ;;  %v1865_v4 = vrot.slane %v1840_v61, %v1856_v37  ;;  %v1869_v6 = vrot.slane %v1841_v62, %v1856_v37 }
 0x964   : > { %v1873_v31 = vrot.slane %v1842_v63, %v1856_v37  ;;  %v1877_v10 = vrot.slane %v1843_v1, %v1856_v37  ;;  %v1881_v12 = vrot.slane %v1844_v5, %v1856_v37  ;;  %v1885_v18 = vrot.slane %v1845_v15, %v1856_v37 }
 0x965   : > { %v1887_v7 = vsel %vm1886_vm5, %v1861_v3, %v1857_v2 }
 0x966   : > { %v1889_v9 = vsel %vm1888_vm6, %v1865_v4, %v1887_v7 }
 0x967   : > { %v1891_v11 = vsel %vm1890_vm7, %v1869_v6, %v1889_v9 }
 0x968   : > { %v1893_v13 = vsel %vm1892_vm0, %v1873_v31, %v1891_v11 }
 0x969   : > { %v1895_v16 = vsel %vm1894_vm8, %v1877_v10, %v1893_v13 }
 0x96a   : > { %v1897_v19 = vsel %vm1896_vm9, %v1881_v12, %v1895_v16 }
 0x96b   : > { %v1899_v20 = vsel %vm1898_vm10, %v1885_v18, %v1897_v19 }
 0x96c   : > { %1901 = vst.msk [vmem:[%s349_s23] sm:$0xff] %vm1272_vm13, %v1899_v20 }
 0x96d PF: > { %s18_s27 = sadd.s32 1, %s2276_s27  }
 0x96e   : > { %p15_p5 = scmp.ge.s32.totalorder %s18_s27, 4  }
 0x970   :  { %17 = sbr.rel (!%p15_p5) target bundleno = 1 (0x1), region = 90 }

</bundles_post_ra>
